<compile_context>
chip_gen: v7x
topology: tpu7x:2x2x1
jax: 0.10.0
libtpu: 0.0.40
codegen_flags: <defaults>
</compile_context>

<pallas_src>
import jax
import jax.numpy as jnp
from jax.experimental import pallas as pl
from jax.experimental.pallas import tpu as pltpu


def _discrimiter_kernel(x_ref, wt_ref, b_ref, o_ref):
    # x_ref: (TB, L), wt_ref: (L, 1) pre-transposed weight, b_ref: (1, 1)
    z = jnp.dot(x_ref[...], wt_ref[...],
                preferred_element_type=jnp.float32) + b_ref[...]
    # sigmoid = 1 / (1 + exp(-z)): exp runs on the EUP slot, divide on the VPU.
    o_ref[...] = (1.0 / (1.0 + jnp.exp(-z))).astype(o_ref.dtype)


@jax.jit
def discrimiter_forward(x, w, b):
    """x: (B, L) f32; w: (1, L) in PyTorch nn.Linear layout; b: (1,)."""
    B, L = x.shape
    w_t = w.T.astype(jnp.float32)            # (L, 1): one-time XLA transpose
    b2 = b.reshape(1, 1).astype(jnp.float32)

    # Largest batch tile up to 1024 rows (multiple of 8 when B > 1024; equals
    # full B otherwise). 1024 * 200 f32 * 2 buffers ~ 1.6 MiB << VMEM on all gens.
    tb = B if B <= 1024 else 1024
    grid = (pl.cdiv(B, tb),)

    return pl.pallas_call(
        _discrimiter_kernel,
        out_shape=jax.ShapeDtypeStruct((B, 1), jnp.float32),
        grid=grid,
        in_specs=[
            pl.BlockSpec((tb, L), lambda i: (i, 0)),   # x: tiled over batch
            pl.BlockSpec((L, 1), lambda i: (0, 0)),    # w_t: resident weight
            pl.BlockSpec((1, 1), lambda i: (0, 0)),    # bias: resident
        ],
        out_specs=pl.BlockSpec((tb, 1), lambda i: (i, 0)),
        compiler_params=pltpu.CompilerParams(
            dimension_semantics=("parallel",)),
    )(x, w_t, b2)


def _xavier_uniform(key, shape):
    fan_out, fan_in = shape
    bound = jnp.sqrt(6.0 / (fan_in + fan_out))
    return jax.random.uniform(key, shape, jnp.float32, -bound, bound)


if __name__ == "__main__":
    # Small but shape-consistent with the module: n_latents defaults to 200.
    B, L = 8, 200

    root = jax.random.PRNGKey(0)
    k_x, k_w = jax.random.split(root, 2)

    x = jax.random.normal(k_x, (B, L), jnp.float32)
    w = _xavier_uniform(k_w, (1, L))          # nn.Linear weight layout (out, in)
    b = jnp.zeros((1,), jnp.float32)          # torch.nn.init.constant_(bias, 0.0)

    y = jax.block_until_ready(discrimiter_forward(x, w, b))

    # Pure-JAX reference for a sanity check.
    y_ref = jax.nn.sigmoid(x @ w.T + b)

    assert y.shape == (B, 1)
    assert jnp.allclose(y, y_ref, atol=1e-5, rtol=1e-5)

    print("KERNEL_OK")
</pallas_src>

<mosaic_0001>
module attributes {stable_mosaic.version = 11 : i64} {
  func.func @_discrimiter_kernel(%arg0: i32, %arg1: memref<8x200xf32, #tpu.memory_space<vmem>>, %arg2: memref<200x1xf32, #tpu.memory_space<vmem>>, %arg3: memref<1x1xf32, #tpu.memory_space<vmem>>, %arg4: memref<8x1xf32, #tpu.memory_space<vmem>>) attributes {dimension_semantics = [#tpu.dimension_semantics<parallel>], iteration_bounds = array<i64: 1>, scalar_prefetch = 0 : i64, scratch_operands = 0 : i64, tpu.core_type = #tpu.core_type<tc>, window_params = [{transform_indices = @transform_0, window_bounds = array<i64: 8, 200>}, {pipeline_mode = #tpu.pipeline_mode<synchronous>, transform_indices = @transform_1, window_bounds = array<i64: 200, 1>}, {pipeline_mode = #tpu.pipeline_mode<synchronous>, transform_indices = @transform_2, window_bounds = array<i64: 1, 1>}, {transform_indices = @transform_3, window_bounds = array<i64: 8, 1>}]} {
    %c0 = arith.constant 0 : index
    %c0_0 = arith.constant 0 : index
    %0 = vector.load %arg1[%c0, %c0_0] : memref<8x200xf32, #tpu.memory_space<vmem>>, vector<8x200xf32>
    %c0_1 = arith.constant 0 : index
    %c0_2 = arith.constant 0 : index
    %1 = vector.load %arg2[%c0_1, %c0_2] : memref<200x1xf32, #tpu.memory_space<vmem>>, vector<200x1xf32>
    %cst = arith.constant dense<0.000000e+00> : vector<8x1xf32>
    %2 = tpu.matmul %0, %1, %cst {dimension_numbers = #tpu.dot_dimension_numbers<[1], [0], [0], [1], [0, 0, 1, 1], [], []>} : vector<8x200xf32>, vector<200x1xf32>, vector<8x1xf32> -> vector<8x1xf32>
    %c0_3 = arith.constant 0 : index
    %c0_4 = arith.constant 0 : index
    %3 = vector.load %arg3[%c0_3, %c0_4] : memref<1x1xf32, #tpu.memory_space<vmem>>, vector<1x1xf32>
    %4 = vector.broadcast %3 : vector<1x1xf32> to vector<8x1xf32>
    %5 = arith.addf %2, %4 : vector<8x1xf32>
    %cst_5 = arith.constant 0.000000e+00 : f32
    %6 = vector.broadcast %cst_5 : f32 to vector<8x1xf32>
    %7 = arith.subf %6, %5 : vector<8x1xf32>
    %8 = math.exp %7 : vector<8x1xf32>
    %cst_6 = arith.constant 1.000000e+00 : f32
    %9 = vector.broadcast %cst_6 : f32 to vector<8x1xf32>
    %10 = arith.addf %9, %8 : vector<8x1xf32>
    %cst_7 = arith.constant 1.000000e+00 : f32
    %11 = vector.broadcast %cst_7 : f32 to vector<8x1xf32>
    %12 = arith.divf %11, %10 : vector<8x1xf32>
    %c0_8 = arith.constant 0 : index
    %c0_9 = arith.constant 0 : index
    %13 = vector.load %arg4[%c0_8, %c0_9] : memref<8x1xf32, #tpu.memory_space<vmem>>, vector<8x1xf32>
    tpu.vector_store %arg4[%c0_8, %c0_9], %12 {strides = array<i32>} : memref<8x1xf32, #tpu.memory_space<vmem>>, vector<8x1xf32>,
    return
  }
  func.func @transform_0(%arg0: i32) -> (i32, i32) {
    %c0_i32 = arith.constant 0 : i32
    %c0_i32_0 = arith.constant 0 : i32
    return %arg0, %c0_i32 : i32, i32
  }
  func.func @transform_1(%arg0: i32) -> (i32, i32) {
    %c0_i32 = arith.constant 0 : i32
    %c0_i32_0 = arith.constant 0 : i32
    %c0_i32_1 = arith.constant 0 : i32
    return %c0_i32, %c0_i32_0 : i32, i32
  }
  func.func @transform_2(%arg0: i32) -> (i32, i32) {
    %c0_i32 = arith.constant 0 : i32
    %c0_i32_0 = arith.constant 0 : i32
    %c0_i32_1 = arith.constant 0 : i32
    return %c0_i32, %c0_i32_0 : i32, i32
  }
  func.func @transform_3(%arg0: i32) -> (i32, i32) {
    %c0_i32 = arith.constant 0 : i32
    %c0_i32_0 = arith.constant 0 : i32
    return %arg0, %c0_i32 : i32, i32
  }
}

</mosaic_0001>

<bundles_post_ra>
// kernel: discrimiter_forward.1
= control target key start
LH: loop header
LB: loop body
LE: loop exit
PB: predicated region body
PF: predicated region fallthrough
CT: control target
= control target key end

     0   :  { %v180_v0 = vmov 0.0|0.0   ;;  %vm50_vm0 = vcmask 588800   ;;  %v181_v39 = vmov 0.0   ;;  %vm130_vm1 = vcmask 7168   ;;  %s301_s1 = inlined_call_operand.vmem [shape: f32[200,1], index: 1, kind: input, shape index: {}]   ;;  %s302_s2 = inlined_call_operand.<no memory space> [shape: f32[1,1], index: 2, kind: input, shape index: {}]   ;;  %s303_s0 = inlined_call_operand.vmem [shape: f32[8,200], index: 0, kind: input, shape index: {}]   ;;  %s304_s3 = inlined_call_operand.vmem [shape: f32[8,1], index: 3, kind: output, shape index: {}]  }
   0x1   :  { %138 = vmatprep.subr.bf16.mxu0 %v180_v0  ;;  %v18_v1 = vld [vmem:[%s301_s1] sm:$0xff]  ;;  %v19_v2 = vld [vmem:[%s301_s1 + $0x8] sm:$0xff]  ;;  %v20_v3 = vld [vmem:[%s301_s1 + $0x10] sm:$0xff]  ;;  %v8_v4 = vstv %s302_s2 }
   0x2   :  { %v139_v5 = vpack.c.bf16 %v19_v2, %v18_v1  ;;  %v21_v6 = vld [vmem:[%s301_s1 + $0x18] sm:$0xff]  ;;  %9 = vst [vmem:[#allocation2] sm:$0x1] %v8_v4  ;;  %v22_v8 = vld [vmem:[%s301_s1 + $0x20] sm:$0xff]  ;;  %v23_v9 = vld [vmem:[%s301_s1 + $0x28] sm:$0xff] }
   0x3   :  { %v142_v7 = vpack.c.bf16 %v21_v6, %v20_v3  ;;  %v145_v10 = vpack.c.bf16 %v23_v9, %v22_v8  ;;  %v24_v11 = vld [vmem:[%s301_s1 + $0x30] sm:$0xff]  ;;  %v25_v12 = vld [vmem:[%s301_s1 + $0x38] sm:$0xff]  ;;  %v17_v13 = vld [vmem:[%s303_s0 + $0x8] sm:$0xff] }
   0x4   :  { %140 = vmatpush1.bf16.msra.mxu0 %v139_v5  ;;  %137 = vmatprep.mubr.msk.f32.mxu0 %vm50_vm0, %v17_v13  ;;  %v148_v14 = vpack.c.bf16 %v25_v12, %v24_v11  ;;  %v26_v15 = vld [vmem:[%s301_s1 + $0x40] sm:$0xff]  ;;  %v27_v16 = vld [vmem:[%s301_s1 + $0x48] sm:$0xff]  ;;  %v28_v18 = vld [vmem:[%s301_s1 + $0x50] sm:$0xff] }
   0x5   :  { %141 = vmatprep.subr.bf16.mxu0 %v180_v0  ;;  %v151_v17 = vpack.c.bf16 %v27_v16, %v26_v15  ;;  %v29_v19 = vld [vmem:[%s301_s1 + $0x58] sm:$0xff]  ;;  %v30_v21 = vld [vmem:[%s301_s1 + $0x60] sm:$0xff]  ;;  %v31_v22 = vld [vmem:[%s301_s1 + $0x68] sm:$0xff] }
   0x6   :  { %v154_v20 = vpack.c.bf16 %v29_v19, %v28_v18  ;;  %v157_v23 = vpack.c.bf16 %v31_v22, %v30_v21  ;;  %v32_v24 = vld [vmem:[%s301_s1 + $0x70] sm:$0xff]  ;;  %v33_v25 = vld [vmem:[%s301_s1 + $0x78] sm:$0xff]  ;;  %v34_v27 = vld [vmem:[%s301_s1 + $0x80] sm:$0xff] }
   0x7   :  { %v160_v26 = vpack.c.bf16 %v33_v25, %v32_v24  ;;  %v35_v28 = vld [vmem:[%s301_s1 + $0x88] sm:$0xff]  ;;  %v36_v30 = vld [vmem:[%s301_s1 + $0x90] sm:$0xff]  ;;  %v37_v31 = vld [vmem:[%s301_s1 + $0x98] sm:$0xff] }
   0x8   :  { %143 = vmatpush1.bf16.msra.mxu0 %v142_v7  ;;  %v163_v29 = vpack.c.bf16 %v35_v28, %v34_v27  ;;  %v166_v32 = vpack.c.bf16 %v37_v31, %v36_v30  ;;  %v38_v33 = vld [vmem:[%s301_s1 + $0xa0] sm:$0xff]  ;;  %v39_v34 = vld [vmem:[%s301_s1 + $0xa8] sm:$0xff]  ;;  %v40_v36 = vld [vmem:[%s301_s1 + $0xb0] sm:$0xff] }
   0x9   :  { %144 = vmatprep.subr.bf16.mxu0 %v180_v0  ;;  %v169_v35 = vpack.c.bf16 %v39_v34, %v38_v33  ;;  %v41_v37 = vld [vmem:[%s301_s1 + $0xb8] sm:$0xff]  ;;  %v42_v40 = vld [vmem:[%s301_s1 + $0xc0] sm:$0xff] }
   0xa   :  { %v172_v38 = vpack.c.bf16 %v41_v37, %v40_v36  ;;  %v16_v41 = vld [vmem:[%s303_s0] sm:$0xff] }
   0xb   :  { %v136_v42 = vld [vmem:[#allocation2] ss:$0 sm:$0xff] }
   0xc   :  { %146 = vmatpush1.bf16.msra.mxu0 %v145_v10 }
   0xd   :  { %147 = vmatprep.subr.bf16.mxu0 %v180_v0 }
  0x10   :  { %149 = vmatpush1.bf16.msra.mxu0 %v148_v14 }
  0x11   :  { %150 = vmatprep.subr.bf16.mxu0 %v180_v0 }
  0x14   :  { %152 = vmatpush1.bf16.msra.mxu0 %v151_v17 }
  0x15   :  { %153 = vmatprep.subr.bf16.mxu0 %v180_v0 }
  0x18   :  { %155 = vmatpush1.bf16.msra.mxu0 %v154_v20 }
  0x19   :  { %156 = vmatprep.subr.bf16.mxu0 %v180_v0 }
  0x1c   :  { %158 = vmatpush1.bf16.msra.mxu0 %v157_v23 }
  0x1d   :  { %159 = vmatprep.subr.bf16.mxu0 %v180_v0 }
  0x20   :  { %161 = vmatpush1.bf16.msra.mxu0 %v160_v26 }
  0x21   :  { %162 = vmatprep.subr.bf16.mxu0 %v180_v0 }
  0x24   :  { %164 = vmatpush1.bf16.msra.mxu0 %v163_v29 }
  0x25   :  { %165 = vmatprep.subr.bf16.mxu0 %v180_v0 }
  0x28   :  { %167 = vmatpush1.bf16.msra.mxu0 %v166_v32 }
  0x29   :  { %168 = vmatprep.subr.bf16.mxu0 %v180_v0 }
  0x2c   :  { %170 = vmatpush1.bf16.msra.mxu0 %v169_v35 }
  0x2d   :  { %171 = vmatprep.subr.bf16.mxu0 %v180_v0 }
  0x30   :  { %173 = vmatpush1.bf16.msra.mxu0 %v172_v38 }
  0x31   :  { %102 = vmatprep.subr.mxu0 %v181_v39 }
  0x34   :  { %103 = vmatpush1.msra.mxu0 %v42_v40 }
  0x35   :  { %119 = vmatmul.mubr.f32.vlgmr.msra.gmra.mrb[0].mxu0 %v16_v41 }
 0x108   :  { %v120_v43 = vpop.f32.mrb[0].mxu0 }
 0x109   :  { %v121_v44 = vadd.f32 %v136_v42, %v120_v43  ;;  %v122_v45 = vpop.f32.mrb[1].mxu0 }
 0x10b   :  { %v124_v46 = vsub.f32 0.0, %v121_v44 }
 0x10d   :  { %v125_v47 = vmul.f32 1.442695, %v124_v46 }
 0x10f   :  { %176 = vpow2.f32 %v125_v47 }
 0x119   :  { %v177_v48 = vpop.eup %176 }
 0x11a   :  { %v127_v49 = vadd.f32 1.0, %v177_v48 }
 0x11c   :  { %178 = vrcp.f32 %v127_v49 }
 0x126   :  { %v179_v50 = vpop.eup %178 }
 0x127   :  { %131 = vst.msk [vmem:[%s304_s3] sm:$0xff] %vm130_vm1, %v179_v50 }

</bundles_post_ra>
